<compile_context>
chip_gen: v5e
topology: v5e:2x2
jax: 0.10.0
libtpu: 0.0.40
codegen_flags: <defaults>
</compile_context>

<pallas_src>
import functools

import jax
import jax.numpy as jnp
from jax import lax
from jax.experimental import pallas as pl
from jax.experimental.pallas import tpu as pltpu


def _round_up(x, m):
    return ((x + m - 1) // m) * m


def _make_mlp_kernel(approx_gelu: bool):
    def mlp_kernel(x_ref, w1_ref, b1_ref, w2_ref, b2_ref, o_ref, acc_ref):
        # x_ref : (tm, D_in)     token tile (constant along hidden axis)
        # w1_ref: (D_in, th)     fc1 weight slice (hidden tile k)
        # b1_ref: (1, th)        fc1 bias slice (f32)
        # w2_ref: (th, D_out)    fc2 weight slice (hidden tile k)
        # b2_ref: (1, D_out)     fc2 bias (full, f32)
        # o_ref : (tm, D_out)    output tile (written on last hidden step)
        # acc_ref: (tm, D_out)   f32 accumulator scratch
        k = pl.program_id(1)

        @pl.when(k == 0)
        def _init():
            # fold fc2 bias into the accumulator init (no per-step add)
            acc_ref[...] = jnp.broadcast_to(
                b2_ref[...].astype(jnp.float32), acc_ref.shape)

        # fc1 partial: full D_in contraction against a hidden-dim slice (MXU,
        # bf16 operands, f32 accumulation)
        h = jnp.dot(x_ref[...], w1_ref[...],
                    preferred_element_type=jnp.float32)
        h = h + b1_ref[...].astype(jnp.float32)
        if approx_gelu:
            # tanh-approx GELU routes to the EUP (cheaper if VALU-bound);
            # numerics differ slightly from torch.nn.GELU() default.
            h = jax.nn.gelu(h, approximate=True)
        else:
            # exact (erf) GELU, matching torch.nn.GELU() default; f32
            h = 0.5 * h * (1.0 + lax.erf(h * jnp.float32(0.7071067811865476)))
        # dropout(p=0.0) is identity -> nothing to do

        # fc2 partial: accumulate this hidden slice's contribution
        acc_ref[...] += jnp.dot(h.astype(w2_ref.dtype), w2_ref[...],
                                preferred_element_type=jnp.float32)

        @pl.when(k == pl.num_programs(1) - 1)
        def _finalize():
            o_ref[...] = acc_ref[...].astype(o_ref.dtype)

    return mlp_kernel


def mlp_forward(x, w1, b1, w2, b2, *, tm=1024, th=1024,
                compute_dtype=jnp.bfloat16, approx_gelu=False):
    """x: [B, N, D_in] -> [B, N, D_out]  (fused Linear-GELU-Linear).

    Weights are stored already transposed from nn.Linear's [out, in]:
      w1: [D_in, D_hid], b1: [D_hid], w2: [D_hid, D_out], b2: [D_out].
    """
    B, N, D_in = x.shape
    D_hid = w1.shape[1]
    D_out = w2.shape[1]
    M = B * N
    out_dtype = x.dtype

    # --- mixed precision: bf16 operands for the MXU, f32 biases/accumulator --
    # TODO(synk): in production, cast + pad the parameters once at setup time
    # instead of on every forward call.
    x = x.astype(compute_dtype)
    w1 = w1.astype(compute_dtype)
    w2 = w2.astype(compute_dtype)
    b1 = b1.astype(jnp.float32)
    b2 = b2.astype(jnp.float32)

    # --- choose tile sizes (8/128 aligned, clamped for small shapes) ---------
    tm = min(tm, _round_up(M, 8))            # token-tile rows (sublane mult.)
    # ensure >= 2 token tiles so the "parallel" axis can shard across the two
    # TensorCores on v7x (harmless on v5e/v6e)
    tm = min(tm, max(8, _round_up(pl.cdiv(M, 2), 8)))
    th = min(th, _round_up(D_hid, 128))      # hidden-tile cols (lane multiple)

    M_pad = _round_up(M, tm)
    H_pad = _round_up(D_hid, th)

    # --- pad token / hidden axes with zeros (mathematically neutral: padded
    #     hidden cols of w1 / rows of w2 are zero so they contribute nothing;
    #     padded token rows are sliced off after the call) --------------------
    x2d = x.reshape(M, D_in)
    if M_pad != M:
        x2d = jnp.pad(x2d, ((0, M_pad - M), (0, 0)))
    if H_pad != D_hid:
        w1 = jnp.pad(w1, ((0, 0), (0, H_pad - D_hid)))
        b1 = jnp.pad(b1, ((0, H_pad - D_hid),))
        w2 = jnp.pad(w2, ((0, H_pad - D_hid), (0, 0)))
    b1_2d = b1.reshape(1, H_pad)
    b2_2d = b2.reshape(1, D_out)

    grid = (M_pad // tm, H_pad // th)

    # --- derive vmem limit from the actual tile footprint (+headroom) --------
    # 2x double-buffered inputs/outputs + f32 accumulator scratch.
    csz = jnp.dtype(compute_dtype).itemsize
    osz = jnp.dtype(out_dtype).itemsize
    footprint = (
        2 * (tm * D_in * csz              # x tile bufs
             + D_in * th * csz            # w1 slice bufs
             + th * 4                     # b1 slice bufs (f32)
             + th * D_out * csz           # w2 slice bufs
             + D_out * 4                  # b2 bufs (f32)
             + tm * D_out * osz)          # out tile bufs
        + tm * D_out * 4)                 # f32 accumulator
    vmem_limit_bytes = int(min(footprint * 5 // 4 + (4 << 20), 100 << 20))

    out2d = pl.pallas_call(
        _make_mlp_kernel(approx_gelu),
        out_shape=jax.ShapeDtypeStruct((M_pad, D_out), out_dtype),
        grid_spec=pltpu.PrefetchScalarGridSpec(
            num_scalar_prefetch=0,
            grid=grid,
            in_specs=[
                pl.BlockSpec((tm, D_in), lambda i, k: (i, 0)),    # x tile
                pl.BlockSpec((D_in, th), lambda i, k: (0, k)),    # w1 slice
                pl.BlockSpec((1, th), lambda i, k: (0, k)),       # b1 slice
                pl.BlockSpec((th, D_out), lambda i, k: (k, 0)),   # w2 slice
                pl.BlockSpec((1, D_out), lambda i, k: (0, 0)),    # b2 (full)
            ],
            out_specs=pl.BlockSpec((tm, D_out), lambda i, k: (i, 0)),
            scratch_shapes=[pltpu.VMEM((tm, D_out), jnp.float32)],
        ),
        compiler_params=pltpu.CompilerParams(
            dimension_semantics=("parallel", "arbitrary"),
            vmem_limit_bytes=vmem_limit_bytes,
        ),
    )(x2d, w1, b1_2d, w2, b2_2d)

    return out2d[:M].reshape(B, N, D_out)


if __name__ == "__main__":
    # Small shapes consistent with the module: tokens [B, N, D_in]
    B, N = 2, 8
    in_features = 32
    hidden_features = 64
    out_features = 32

    key = jax.random.PRNGKey(0)
    kx, kw1, kb1, kw2, kb2 = jax.random.split(key, 5)

    x = jax.random.normal(kx, (B, N, in_features), dtype=jnp.float32)

    # Deterministic parameter init (nn.Linear shapes, stored transposed)
    w1 = jax.random.normal(kw1, (in_features, hidden_features), jnp.float32) * 0.02
    b1 = jax.random.normal(kb1, (hidden_features,), jnp.float32) * 0.02
    w2 = jax.random.normal(kw2, (hidden_features, out_features), jnp.float32) * 0.02
    b2 = jax.random.normal(kb2, (out_features,), jnp.float32) * 0.02

    # Reference in plain JAX (exact-erf GELU like torch.nn.GELU default)
    ref_h = jax.nn.gelu(x @ w1 + b1, approximate=False)
    ref = ref_h @ w2 + b2

    # 1) tight check with f32 compute (bit-faithful to the reference path)
    out_f32 = mlp_forward(x, w1, b1, w2, b2, compute_dtype=jnp.float32)
    jax.block_until_ready(out_f32)
    assert out_f32.shape == (B, N, out_features)
    assert jnp.allclose(out_f32, ref, atol=1e-5, rtol=1e-5), "f32 mismatch"

    # 2) optimized bf16 mixed-precision path (looser tolerance: bf16 operands)
    out_bf16 = mlp_forward(x, w1, b1, w2, b2, compute_dtype=jnp.bfloat16)
    jax.block_until_ready(out_bf16)
    assert out_bf16.shape == (B, N, out_features)
    assert jnp.allclose(out_bf16, ref, atol=1e-2, rtol=5e-2), "bf16 mismatch"

    print("KERNEL_OK")
</pallas_src>

<mosaic_0001>
module attributes {stable_mosaic.version = 11 : i64} {
  func.func @mlp_kernel(%arg0: i32, %arg1: i32, %arg2: memref<8x32xf32, #tpu.memory_space<vmem>>, %arg3: memref<32x128xf32, #tpu.memory_space<vmem>>, %arg4: memref<1x128xf32, #tpu.memory_space<vmem>>, %arg5: memref<128x32xf32, #tpu.memory_space<vmem>>, %arg6: memref<1x32xf32, #tpu.memory_space<vmem>>, %arg7: memref<8x32xf32, #tpu.memory_space<vmem>>, %arg8: memref<8x32xf32, #tpu.memory_space<vmem>>) attributes {dimension_semantics = [#tpu.dimension_semantics<parallel>, #tpu.dimension_semantics<arbitrary>], iteration_bounds = array<i64: 2, 1>, scalar_prefetch = 0 : i64, scratch_operands = 1 : i64, tpu.core_type = #tpu.core_type<tc>, window_params = [{transform_indices = @transform_0, window_bounds = array<i64: 8, 32>}, {transform_indices = @transform_1, window_bounds = array<i64: 32, 128>}, {transform_indices = @transform_2, window_bounds = array<i64: 1, 128>}, {transform_indices = @transform_3, window_bounds = array<i64: 128, 32>}, {pipeline_mode = #tpu.pipeline_mode<synchronous>, transform_indices = @transform_4, window_bounds = array<i64: 1, 32>}, {transform_indices = @transform_5, window_bounds = array<i64: 8, 32>}]} {
    %c0_i32 = arith.constant 0 : i32
    %0 = arith.cmpi eq, %arg1, %c0_i32 : i32
    %1 = arith.extui %0 : i1 to i32
    %c0_i32_0 = arith.constant 0 : i32
    %2 = arith.cmpi ne, %1, %c0_i32_0 : i32
    scf.if %2 {
      %c0_18 = arith.constant 0 : index
      %c0_19 = arith.constant 0 : index
      %25 = vector.load %arg6[%c0_18, %c0_19] : memref<1x32xf32, #tpu.memory_space<vmem>>, vector<1x32xf32>
      %26 = vector.shape_cast %25 : vector<1x32xf32> to vector<1x32xf32>
      %27 = vector.broadcast %26 : vector<1x32xf32> to vector<8x32xf32>
      %c0_20 = arith.constant 0 : index
      %c0_21 = arith.constant 0 : index
      %28 = vector.load %arg8[%c0_20, %c0_21] : memref<8x32xf32, #tpu.memory_space<vmem>>, vector<8x32xf32>
      tpu.vector_store %arg8[%c0_20, %c0_21], %27 {strides = array<i32>} : memref<8x32xf32, #tpu.memory_space<vmem>>, vector<8x32xf32>,
    } else {
    }
    %c0 = arith.constant 0 : index
    %c0_1 = arith.constant 0 : index
    %3 = vector.load %arg2[%c0, %c0_1] : memref<8x32xf32, #tpu.memory_space<vmem>>, vector<8x32xf32>
    %c0_2 = arith.constant 0 : index
    %c0_3 = arith.constant 0 : index
    %4 = vector.load %arg3[%c0_2, %c0_3] : memref<32x128xf32, #tpu.memory_space<vmem>>, vector<32x128xf32>
    %cst = arith.constant dense<0.000000e+00> : vector<8x128xf32>
    %5 = tpu.matmul %3, %4, %cst {dimension_numbers = #tpu.dot_dimension_numbers<[1], [0], [0], [1], [0, 0, 1, 1], [], []>} : vector<8x32xf32>, vector<32x128xf32>, vector<8x128xf32> -> vector<8x128xf32>
    %c0_4 = arith.constant 0 : index
    %c0_5 = arith.constant 0 : index
    %6 = vector.load %arg4[%c0_4, %c0_5] : memref<1x128xf32, #tpu.memory_space<vmem>>, vector<1x128xf32>
    %7 = vector.broadcast %6 : vector<1x128xf32> to vector<8x128xf32>
    %8 = arith.addf %5, %7 : vector<8x128xf32>
    %cst_6 = arith.constant 5.000000e-01 : f32
    %9 = vector.broadcast %cst_6 : f32 to vector<8x128xf32>
    %10 = arith.mulf %9, %8 : vector<8x128xf32>
    %cst_7 = arith.constant 0.707106769 : f32
    %11 = vector.broadcast %cst_7 : f32 to vector<8x128xf32>
    %12 = arith.mulf %8, %11 : vector<8x128xf32>
    %13 = math.erf %12 : vector<8x128xf32>
    %cst_8 = arith.constant 1.000000e+00 : f32
    %14 = vector.broadcast %cst_8 : f32 to vector<8x128xf32>
    %15 = arith.addf %14, %13 : vector<8x128xf32>
    %16 = arith.mulf %10, %15 : vector<8x128xf32>
    %c0_9 = arith.constant 0 : index
    %c0_10 = arith.constant 0 : index
    %17 = vector.load %arg8[%c0_9, %c0_10] : memref<8x32xf32, #tpu.memory_space<vmem>>, vector<8x32xf32>
    %c0_11 = arith.constant 0 : index
    %c0_12 = arith.constant 0 : index
    %18 = vector.load %arg5[%c0_11, %c0_12] : memref<128x32xf32, #tpu.memory_space<vmem>>, vector<128x32xf32>
    %cst_13 = arith.constant dense<0.000000e+00> : vector<8x32xf32>
    %19 = tpu.matmul %16, %18, %cst_13 {dimension_numbers = #tpu.dot_dimension_numbers<[1], [0], [0], [1], [0, 0, 1, 1], [], []>} : vector<8x128xf32>, vector<128x32xf32>, vector<8x32xf32> -> vector<8x32xf32>
    %20 = arith.addf %17, %19 : vector<8x32xf32>
    %c0_14 = arith.constant 0 : index
    %c0_15 = arith.constant 0 : index
    %21 = vector.load %arg8[%c0_14, %c0_15] : memref<8x32xf32, #tpu.memory_space<vmem>>, vector<8x32xf32>
    tpu.vector_store %arg8[%c0_14, %c0_15], %20 {strides = array<i32>} : memref<8x32xf32, #tpu.memory_space<vmem>>, vector<8x32xf32>,
    %c0_i32_16 = arith.constant 0 : i32
    %22 = arith.cmpi eq, %arg1, %c0_i32_16 : i32
    %23 = arith.extui %22 : i1 to i32
    %c0_i32_17 = arith.constant 0 : i32
    %24 = arith.cmpi ne, %23, %c0_i32_17 : i32
    scf.if %24 {
      %c0_18 = arith.constant 0 : index
      %c0_19 = arith.constant 0 : index
      %25 = vector.load %arg8[%c0_18, %c0_19] : memref<8x32xf32, #tpu.memory_space<vmem>>, vector<8x32xf32>
      %c0_20 = arith.constant 0 : index
      %c0_21 = arith.constant 0 : index
      %26 = vector.load %arg7[%c0_20, %c0_21] : memref<8x32xf32, #tpu.memory_space<vmem>>, vector<8x32xf32>
      tpu.vector_store %arg7[%c0_20, %c0_21], %25 {strides = array<i32>} : memref<8x32xf32, #tpu.memory_space<vmem>>, vector<8x32xf32>,
    } else {
    }
    return
  }
  func.func @transform_0(%arg0: i32, %arg1: i32) -> (i32, i32) {
    %c0_i32 = arith.constant 0 : i32
    %c0_i32_0 = arith.constant 0 : i32
    return %arg0, %c0_i32 : i32, i32
  }
  func.func @transform_1(%arg0: i32, %arg1: i32) -> (i32, i32) {
    %c0_i32 = arith.constant 0 : i32
    %c0_i32_0 = arith.constant 0 : i32
    return %c0_i32, %arg1 : i32, i32
  }
  func.func @transform_2(%arg0: i32, %arg1: i32) -> (i32, i32) {
    %c0_i32 = arith.constant 0 : i32
    %c0_i32_0 = arith.constant 0 : i32
    return %c0_i32, %arg1 : i32, i32
  }
  func.func @transform_3(%arg0: i32, %arg1: i32) -> (i32, i32) {
    %c0_i32 = arith.constant 0 : i32
    %c0_i32_0 = arith.constant 0 : i32
    return %arg1, %c0_i32 : i32, i32
  }
  func.func @transform_4(%arg0: i32, %arg1: i32) -> (i32, i32) {
    %c0_i32 = arith.constant 0 : i32
    %c0_i32_0 = arith.constant 0 : i32
    %c0_i32_1 = arith.constant 0 : i32
    return %c0_i32, %c0_i32_0 : i32, i32
  }
  func.func @transform_5(%arg0: i32, %arg1: i32) -> (i32, i32) {
    %c0_i32 = arith.constant 0 : i32
    %c0_i32_0 = arith.constant 0 : i32
    return %arg0, %c0_i32 : i32, i32
  }
}

</mosaic_0001>

<bundles_post_ra>
// kernel: tpu_custom_call.1
= control target key start
LH: loop header
LB: loop body
LE: loop exit
PB: predicated region body
PF: predicated region fallthrough
CT: control target
= control target key end

     0   :  { %10 = vsyncpa [#allocation4], 0  ;;  %s893_s0 = inlined_call_operand.vmem [shape: f32[16,32], index: 0, kind: input, shape index: {}]   ;;  %s894_s1 = inlined_call_operand.vmem [shape: f32[32,128], index: 1, kind: input, shape index: {}]   ;;  %s895_s2 = inlined_call_operand.vmem [shape: f32[1,128], index: 2, kind: input, shape index: {}]   ;;  %s896_s3 = inlined_call_operand.vmem [shape: f32[128,32], index: 3, kind: input, shape index: {}]   ;;  %s897_s4 = inlined_call_operand.vmem [shape: f32[1,32], index: 4, kind: input, shape index: {}]   ;;  %s898_s5 = inlined_call_operand.hbm [shape: f32[16,32], index: 5, kind: output, shape index: {}]  }
   0x1   :  { %12 = vsyncpa [#allocation4 + $0x1], 0  ;;  %s726_s18 = smov 0   ;;  %s728_s19 = smov 0  }
   0x2   :  { %s730_s20 = smov 0   ;;  %s732_s21 = smov 0  }
   0x3   :  { %s734_s22 = smov 0   ;;  %s736_s23 = smov 0  }
   0x4 LB: > { %s541_s24 = sadd.s32 4294967295, %s694_s23   ;;  %s542_s25 = sadd.s32 4294967294, %s694_s23   ;;  %s694_s23 = sphi %s736_s23, %s18_s23   ;;  %s690_s22 = sphi %s734_s22, %s905_s22   ;;  %s686_s21 = sphi %s732_s21, %s904_s21   ;;  %s682_s20 = sphi %s730_s20, %s903_s20   ;;  %s678_s19 = sphi %s728_s19, %s902_s19   ;;  %s674_s18 = sphi %s726_s18, %s901_s18  }
   0x5   : > { %s30_s26 = sadd.s32 1, %s690_s22  ;;  %s162_s27 = sadd.s32 1, %s682_s20 }
   0x6   : > { %p32_p0 = scmp.ge.s32.totalorder %s30_s26, 2  ;;  %p172_p1 = scmp.ne.s32.totalorder %s682_s20, %s678_s19 }
   0x7   : > { %p173_p2 = scmp.eq.s32.totalorder %s541_s24, 1  ;;  %p178_p3 = scmp.ne.s32.totalorder %s678_s19, %s674_s18 }
   0x8   : > { %s907_s26 = smov (%p32_p0, %s30_s26), 0  ;;  %p179_p5 = scmp.eq.s32.totalorder %s542_s25, 1 }
   0x9   : > { %p766_p4 = por %p173_p2, %p172_p1  ;;  %s159_s29 = ssub.s32 %s690_s22, %s907_s26 }
   0xa   : > { %p548_p6 = scmp.ge.s32.totalorder %s694_s23, 1  ;;  %p160_p7 = scmp.eq.s32.totalorder %s159_s29, 0 }
   0xb   : > { %p773_p8 = por %p179_p5, %p178_p3  ;;  %p229_p9 = scmp.lt.s32.totalorder %s694_s23, 3 }
   0xc   : > { %s779_s6 = scalar_select %p160_p7, %s682_s20, %s162_s27  }
   0xd   : > { %p230_p10 = pnand %p548_p6, %p229_p9 }
   0xe   : > { %p268_p11 = scmp.lt.s32.totalorder (!%p230_p10), %s686_s21, 1  ;;  %s265_s11 = sand.u32 (!%p230_p10), 1, %s678_s19  }
   0xf   : > { %233 = sbr.rel (%p230_p10) target bundleno = 346 (0x15a), region = 40  ;;  %s549_s12 = sshll.u32 (!%p230_p10), %s265_s11, 3 }
  0x10   : > { %s554_s13 = sshll.u32 (!%p230_p10), %s686_s21, 3  ;;  %s267_s17 = scalar_lea.vmem (!%p230_p10), [#allocation3], %s549_s12 }
  0x11   : > { %s427_s16 = scalar_lea.hbm (!%p230_p10), %s898_s5, %s554_s13  ;;  %s417_s27 = scalar_lea.sflag (!%p230_p10), [#allocation4], %s265_s11 }
  0x12   : > { %s431_s25 = sshll.u32 (!%p230_p10), %s427_s16, 4  ;;  %s636_s9 = scalar_lea.hbm (!%p230_p10), %s898_s5, 16  ;;  %s432_s25 = int_to_ptr.hbm [resolvable:$true] %s431_s25 }
  0x14   : > { %v299_v0 = vld [vmem:[%s894_s1 + $0x18] sm:$0xff]  ;;  %v298_v1 = vld [vmem:[%s894_s1 + $0x10] sm:$0xff]  ;;  %v612_v2 = vld [vmem:[%s897_s4] ss:$0 sm:$0xff]  ;;  %s269_s15 = scalar_select %p268_p11, %s686_s21, 1  ;;  %vm293_vm0 = vcmask 261120  }
  0x15   : > { %320 = vmatpush.msra.mxu0 %v299_v0  ;;  %v297_v3 = vld [vmem:[%s894_s1 + $0x8] sm:$0xff]  ;;  %294 = vst.msk [vmem:[#allocation2] sm:$0xff] %vm293_vm0, %v612_v2  ;;  %v296_v4 = vld [vmem:[%s894_s1] sm:$0xff]  ;;  %v388_v6 = vld [vmem:[%s896_s3 + $0x78] sm:$0xff] }
  0x16   : > { %s550_s24 = sshll.u32 %s269_s15, 3  ;;  %389 = vmatpush.msra.mxu1 %v388_v6  ;;  %v387_v7 = vld [vmem:[%s896_s3 + $0x70] sm:$0xff]  ;;  %v386_v8 = vld [vmem:[%s896_s3 + $0x68] sm:$0xff]  ;;  %v385_v9 = vld [vmem:[%s896_s3 + $0x60] sm:$0xff] }
  0x17   : > { %321 = vmatpush.msra.mxu0 %v298_v1  ;;  %s271_s29 = scalar_lea.vmem %s893_s0, %s550_s24  ;;  %v613_v10 = vld [vmem:[%s895_s2] ss:$0 sm:$0xff]  ;;  %v384_v11 = vld [vmem:[%s896_s3 + $0x58] sm:$0xff]  ;;  %v383_v12 = vld [vmem:[%s896_s3 + $0x50] sm:$0xff]  ;;  %s429_s24 = sshll.u32 %s267_s17, 4  ;;  %s430_s24 = int_to_ptr.vmem [resolvable:$true] %s429_s24 }
  0x18   : > { %v295_v5 = vld [vmem:[%s271_s29] sm:$0xff]  ;;  %390 = vmatpush.msra.mxu1 %v387_v7  ;;  %v382_v14 = vld [vmem:[%s896_s3 + $0x48] sm:$0xff]  ;;  %v380_v18 = vld [vmem:[%s896_s3 + $0x38] sm:$0xff]  ;;  %s630_s29 = sshra.s32 %s432_s25, 4  ;;  %s631_s29 = int_to_ptr.hbm [resolvable:$true] %s630_s29 }
  0x19   : > { %322 = vmatpush.msra.mxu0 %v297_v3  ;;  %v381_v16 = vld [vmem:[%s896_s3 + $0x40] sm:$0xff]  ;;  %v379_v20 = vld [vmem:[%s896_s3 + $0x30] sm:$0xff]  ;;  %v378_v22 = vld [vmem:[%s896_s3 + $0x28] sm:$0xff]  ;;  %s632_s21 = scalar_lea.hbm %s631_s29, 8  ;;  %p637_p1 = scmp.lt.s32.totalorder %s631_s29, %s898_s5 }
  0x1a   : > { %391 = vmatpush.msra.mxu1 %v386_v8  ;;  %v377_v25 = vld [vmem:[%s896_s3 + $0x20] sm:$0xff]  ;;  %v376_v28 = vld [vmem:[%s896_s3 + $0x18] sm:$0xff]  ;;  %v375_v31 = vld [vmem:[%s896_s3 + $0x10] sm:$0xff]  ;;  %p633_p12 = scmp.ne.s32.totalorder %s631_s29, %s632_s21  ;;  %p638_p2 = scmp.lt.s32.totalorder %s636_s9, %s632_s21 }
  0x1b   : > { %323 = vmatpush.msra.mxu0 %v296_v4  ;;  %v374_v34 = vld [vmem:[%s896_s3 + $0x8] sm:$0xff]  ;;  %v373_v36 = vld [vmem:[%s896_s3] sm:$0xff] }
  0x1c   : > { %551 = vmatmul.msk.f32.vlgmr.msra.gmra.mxu0 %vm293_vm0, %v295_v5  ;;  %392 = vmatpush.msra.mxu1 %v385_v9  ;;  %v372_v0 = vld [vmem:[#allocation2] sm:$0xff]  ;;  %p634_p13 = pnand %p633_p12, %p766_p4  ;;  %p639_p3 = por %p638_p2, %p637_p1 }
  0x1e   : > { %393 = vmatpush.msra.mxu1 %v384_v11  ;;  %p635_p0 = pneg %p634_p13 }
  0x20   : > { %394 = vmatpush.msra.mxu1 %v383_v12  ;;  %p640_p5 = pnand %p639_p3, %p635_p0 }
  0x22   : > { %395 = vmatpush.msra.mxu1 %v382_v14 }
  0x24   : > { %396 = vmatpush.msra.mxu1 %v381_v16 }
  0x26   : > { %397 = vmatpush.msra.mxu1 %v380_v18 }
  0x28   : > { %398 = vmatpush.msra.mxu1 %v379_v20 }
  0x2a   : > { %399 = vmatpush.msra.mxu1 %v378_v22 }
  0x2c   : > { %400 = vmatpush.msra.mxu1 %v377_v25 }
  0x2e   : > { %401 = vmatpush.msra.mxu1 %v376_v28 }
  0x30   : > { %402 = vmatpush.msra.mxu1 %v375_v31 }
  0x32   : > { %403 = vmatpush.msra.mxu1 %v374_v34 }
  0x34   : > { %404 = vmatpush.msra.mxu1 %v373_v36 }
  0x99   : > { %v325_v13 = vpop.f32.mrf.mxu0 }
  0x9a   : > { %v326_v15 = vadd.f32 %v613_v10, %v325_v13 }
  0x9c   : > { %v329_v17 = vmul.f32 0.70710677, %v326_v15  ;;  %v328_v61 = vmul.f32 0.5, %v326_v15 }
  0x9e   : > { %v330_v19 = vmul.f32 %v329_v17, %v329_v17 }
  0xa0   : > { %v331_v21 = vmin.f32 %v330_v19, 16.0 }
  0xa2   : > { %v332_v23 = vmul.f32 2.1237322e-06, %v331_v21  ;;  %v343_v24 = vmul.f32 3.8918573e-05, %v331_v21 }
  0xa4   : > { %v333_v26 = vadd.f32 0.00028619796, %v332_v23  ;;  %v344_v27 = vadd.f32 0.001143296, %v343_v24 }
  0xa6   : > { %v334_v29 = vmul.f32 %v333_v26, %v331_v21  ;;  %v345_v30 = vmul.f32 %v344_v27, %v331_v21 }
  0xa8   : > { %v346_v32 = vadd.f32 0.014752088, %v345_v30  ;;  %v335_v33 = vadd.f32 0.0036580483, %v334_v29 }
  0xaa   : > { %v347_v35 = vmul.f32 %v346_v32, %v331_v21  ;;  %v336_v38 = vmul.f32 %v335_v33, %v331_v21 }
  0xac   : > { %v348_v37 = vadd.f32 0.112945676, %v347_v35  ;;  %v337_v41 = vadd.f32 0.05243302, %v336_v38 }
  0xae   : > { %v349_v39 = vmul.f32 %v348_v37, %v331_v21  ;;  %v338_v44 = vmul.f32 %v337_v41, %v331_v21 }
  0xb0   : > { %v350_v40 = vadd.f32 0.4994258, %v349_v39  ;;  %v339_v45 = vadd.f32 0.18741608, %v338_v44 }
  0xb2   : > { %v351_v42 = vmul.f32 %v350_v40, %v331_v21  ;;  %v340_v47 = vmul.f32 %v339_v45, %v331_v21 }
  0xb4   : > { %v352_v43 = vadd.f32 1.0, %v351_v42  ;;  %v341_v51 = vadd.f32 1.1283791, %v340_v47 }
  0xb6   : > { %614 = vrcp.f32 %v352_v43  ;;  %v364_v50 = vand.u32 2147483648, %v352_v43  ;;  %v362_v53 = vand.u32 2147483647, %v352_v43  ;;  %vm358_vm2 = vweird.f32 %v352_v43 }
  0xb7   : > { %v342_v56 = vmul.f32 %v341_v51, %v329_v17 }
  0xb8   : > { %v365_v55 = vor.u32 1.1754944e-38, %v364_v50  ;;  %vm363_vm4 = vcmp.eq.f32.partialorder %v362_v53, 8.507059e+37 }
  0xbc   : > { %v615_v46 = vpop.eup %614 }
  0xbd   : > { %v354_v48 = vmul.f32 %v615_v46, %v352_v43  ;;  %vm359_vm1 = vweird.f32 %v615_v46 }
  0xbe   : > { %vm360_vm3 = vmor %vm358_vm2, %vm359_vm1 }
  0xbf   : > { %v355_v49 = vsub.f32 1.0, %v354_v48 }
  0xc1   : > { %v356_v52 = vmul.f32 %v615_v46, %v355_v49 }
  0xc3   : > { %v357_v54 = vadd.f32 %v615_v46, %v356_v52 }
  0xc5   : > { %v361_v57 = vsel %vm360_vm3, %v615_v46, %v357_v54 }
  0xc6   : > { %v366_v58 = vsel %vm363_vm4, %v365_v55, %v361_v57 }
  0xc7   : > { %v367_v59 = vmul.f32 %v366_v58, %v342_v56 }
  0xc9   : > { %v552_v60 = vclamps-f32 %v367_v59, 1.0 }
  0xcb   : > { %v370_v62 = vadd.f32 1.0, %v552_v60 }
  0xcd   : > { %v371_v63 = vmul.f32 %v370_v62, %v328_v61 }
  0xcf   : > { %405 = vmatmul.f32.vlgmr.msra.gmra.mxu1 %v371_v63 }
 0x14c   : > { %v406_v1 = vpop.f32.mrf.mxu1 }
 0x14d   : > { %v409_v2 = vadd.f32 %v406_v1, %v372_v0 }
 0x14f   : > { %410 = vst.msk [vmem:[#allocation2] sm:$0xff] %vm293_vm0, %v409_v2 }
 0x156   : > { %v414_v3 = vld [vmem:[#allocation2] sm:$0xff] }
 0x157   : > { %415 = vst.msk [vmem:[%s267_s17] sm:$0xff] %vm293_vm0, %v414_v3 }
 0x158   : > { %643 = shalt.err (!%p640_p5)
}
 0x159   : > { %557 = dma.vmem_to_hbm [thread:$0]  (%p766_p4), %s430_s24, 128, %s432_s25, %s417_s27  }
 0x15a PF: > { %p563_p6 = scmp.ge.s32.totalorder %s694_s23, 2  ;;  %s443_s11 = sand.u32 1, %s674_s18  }
 0x15b   : > { %s444_s13 = scalar_lea.sflag [#allocation4], %s443_s11 }
 0x15c   : > { %p560_p7 = pnand %p563_p6, %p773_p8 }
 0x15e   : > { %p561_p9 = pneg %p560_p7 }
 0x160   : > { %669 = dma.done.wait (%p561_p9), %s444_s13, 128  }
 0x161   : > { %671 = vsyncadd (%p561_p9), %s444_s13, 4294967168  ;;  %s18_s23 = sadd.s32 1, %s694_s23   ;;  %s901_s18 = smov %s678_s19 }
 0x162   : > { %p15_p10 = scmp.ge.s32.totalorder %s18_s23, 4   ;;  %s902_s19 = smov %s682_s20 }
 0x163   : > { %s903_s20 = smov %s779_s6  ;;  %s904_s21 = smov %s690_s22 }
 0x164   : > { %s905_s22 = smov %s907_s26  ;;  %17 = sbr.rel (!%p15_p10) target bundleno = 4 (0x4), region = 92 }
 0x169   :  { %450 = vsyncpa [#allocation4], 1 }
 0x16a   :  { %452 = vsyncpa [#allocation4 + $0x1], 1 }

</bundles_post_ra>
